<compile_context>
chip_gen: v5e
topology: v5e:2x2
jax: 0.10.0
libtpu: 0.0.40
codegen_flags: <defaults>
</compile_context>

<pallas_src>
import jax
import jax.numpy as jnp
from jax.experimental import pallas as pl
from jax.experimental.pallas import tpu as pltpu


_LANES = 128
# Widest lane count first: fewer, wider rows -> dense unmasked vector stores.
_COL_CANDIDATES = (2048, 1024, 512, 256, 128)
# Below this element count the pallas_call launch + pipeline prologue overhead
# dwarfs the work; XLA's fused elementwise round is strictly better there.
_PALLAS_MIN_ELEMS = 1024
# ~2 MiB per block: (1 input + 1 output) x 2 pipeline buffers x 2 MiB = 8 MiB
# VMEM, safely inside the default scoped VMEM on v5e (16 MiB) / v6e (32 MiB) /
# v7x (32 MiB), while large enough that the ~0.35 us per-step overhead is
# negligible (85%+ of HBM roofline regime).
_TARGET_BLOCK_BYTES = 2 * 1024 * 1024


def _round_kernel(x_ref, o_ref):
    # Elementwise round on the VPU; whole tile at once.
    o_ref[...] = jnp.round(x_ref[...])


def _round_2d(x2d: jax.Array) -> jax.Array:
    """Round a lane-dense 2-D slab (cols % 128 == 0) with a tiled streaming kernel."""
    rows, cols = x2d.shape
    bytes_per_row = cols * x2d.dtype.itemsize
    tile_rows = max(32, _TARGET_BLOCK_BYTES // bytes_per_row)
    # Multiple of 32 rows => valid sublane tiling for f32 (8), bf16 (16), int8 (32).
    tile_rows = (tile_rows // 32) * 32
    if rows <= tile_rows:
        # Single block covering the full array (always a legal block shape).
        tile_rows = rows
    grid = (pl.cdiv(rows, tile_rows),)  # ragged last block handled by Pallas
    return pl.pallas_call(
        _round_kernel,
        out_shape=jax.ShapeDtypeStruct((rows, cols), x2d.dtype),
        grid_spec=pltpu.PrefetchScalarGridSpec(
            num_scalar_prefetch=0,
            grid=grid,
            in_specs=[pl.BlockSpec((tile_rows, cols), lambda i: (i, 0))],
            out_specs=pl.BlockSpec((tile_rows, cols), lambda i: (i, 0)),
        ),
        compiler_params=pltpu.CompilerParams(
            dimension_semantics=("parallel",)  # shards the grid across TCs on v7x
        ),
    )(x2d)


def _quantize_fwd_impl(x: jax.Array) -> jax.Array:
    """Elementwise round of an arbitrarily-shaped array."""
    orig_shape = x.shape
    n = x.size
    if n == 0 or n < _PALLAS_MIN_ELEMS:
        # Tiny tensors: XLA's fused round beats kernel launch overhead.
        return jnp.round(x)
    # Common case: element count is a multiple of 128 -> free reshape to the
    # widest lane-dense 2-D slab, no padding, no extra HBM copies.
    for cols in _COL_CANDIDATES:
        if n % cols == 0:
            y2d = _round_2d(x.reshape(n // cols, cols))
            return y2d.reshape(orig_shape)
    # Rare case: element count not lane-aligned -> pad to a multiple of 128.
    pad = (-n) % _LANES
    flat = jnp.pad(x.reshape(-1), (0, pad))
    y2d = _round_2d(flat.reshape(-1, _LANES))
    return y2d.reshape(-1)[:n].reshape(orig_shape)


@jax.custom_vjp
def quantization(x: jax.Array) -> jax.Array:
    return _quantize_fwd_impl(x)


def _quant_fwd(x):
    return _quantize_fwd_impl(x), None


def _quant_bwd(_, g):
    # Straight-through estimator: gradient passes through unchanged.
    return (g,)


quantization.defvjp(_quant_fwd, _quant_bwd)


if __name__ == "__main__":
    key = jax.random.PRNGKey(0)
    k1, k2, k3 = jax.random.split(key, 3)

    # 1) Small NCHW input (module-typical shape): 2048 elems -> Pallas path,
    #    single (1, 2048) lane-dense block.
    x_small = jax.random.uniform(k1, (2, 4, 16, 16), dtype=jnp.float32) * 8.0 - 4.0
    y_small = quantization(x_small)
    jax.block_until_ready(y_small)
    assert y_small.shape == x_small.shape and y_small.dtype == x_small.dtype
    assert bool(jnp.all(y_small == jnp.round(x_small)))

    # 2) Larger lane-aligned input -> Pallas path with multi-step ragged grid
    #    (cols = 2048, rows = 288 > tile_rows = 256 => grid of 2, last block ragged).
    x_big = jax.random.uniform(k2, (4, 12, 128, 96), dtype=jnp.float32) * 8.0 - 4.0
    y_big = quantization(x_big)
    jax.block_until_ready(y_big)
    assert y_big.shape == x_big.shape and y_big.dtype == x_big.dtype
    assert bool(jnp.all(y_big == jnp.round(x_big)))

    # 3) Non-lane-aligned element count -> rare padded Pallas path.
    x_odd = jax.random.uniform(k3, (3, 5, 41, 29), dtype=jnp.float32) * 8.0 - 4.0
    y_odd = quantization(x_odd)
    jax.block_until_ready(y_odd)
    assert y_odd.shape == x_odd.shape
    assert bool(jnp.all(y_odd == jnp.round(x_odd)))

    # Straight-through gradient check.
    g = jax.grad(lambda a: jnp.sum(quantization(a) * 2.0))(x_small)
    jax.block_until_ready(g)
    assert bool(jnp.allclose(g, jnp.full_like(x_small, 2.0)))

    print("KERNEL_OK")
</pallas_src>

<mosaic_0001>
module attributes {stable_mosaic.version = 11 : i64} {
  func.func @_round_kernel(%arg0: i32, %arg1: memref<1x2048xf32, #tpu.memory_space<vmem>>, %arg2: memref<1x2048xf32, #tpu.memory_space<vmem>>) attributes {dimension_semantics = [#tpu.dimension_semantics<parallel>], iteration_bounds = array<i64: 1>, scalar_prefetch = 0 : i64, scratch_operands = 0 : i64, tpu.core_type = #tpu.core_type<tc>, window_params = [{transform_indices = @transform_0, window_bounds = array<i64: 1, 2048>}, {transform_indices = @transform_1, window_bounds = array<i64: 1, 2048>}]} {
    %c0 = arith.constant 0 : index
    %c0_0 = arith.constant 0 : index
    %0 = vector.load %arg1[%c0, %c0_0] : memref<1x2048xf32, #tpu.memory_space<vmem>>, vector<1x2048xf32>
    %1 = math.roundeven %0 : vector<1x2048xf32>
    %c0_1 = arith.constant 0 : index
    %c0_2 = arith.constant 0 : index
    %2 = vector.load %arg2[%c0_1, %c0_2] : memref<1x2048xf32, #tpu.memory_space<vmem>>, vector<1x2048xf32>
    tpu.vector_store %arg2[%c0_1, %c0_2], %1 {strides = array<i32>} : memref<1x2048xf32, #tpu.memory_space<vmem>>, vector<1x2048xf32>,
    return
  }
  func.func @transform_0(%arg0: i32) -> (i32, i32) {
    %c0_i32 = arith.constant 0 : i32
    %c0_i32_0 = arith.constant 0 : i32
    return %arg0, %c0_i32 : i32, i32
  }
  func.func @transform_1(%arg0: i32) -> (i32, i32) {
    %c0_i32 = arith.constant 0 : i32
    %c0_i32_0 = arith.constant 0 : i32
    return %arg0, %c0_i32 : i32, i32
  }
}

</mosaic_0001>

<bundles_post_ra>
// kernel: tpu_custom_call.1
= control target key start
LH: loop header
LB: loop body
LE: loop exit
PB: predicated region body
PF: predicated region fallthrough
CT: control target
= control target key end

     0   :  { %6 = vsyncpa [#allocation3], 0  ;;  %s134_s0 = inlined_call_operand.hbm [shape: f32[1,2048], index: 0, kind: input, shape index: {}]   ;;  %s135_s1 = inlined_call_operand.hbm [shape: f32[1,2048], index: 1, kind: output, shape index: {}]  }
   0x1   :  { %7 = vsyncpa [#allocation4], 0  ;;  %s13_s8 = sshll.u32 %s134_s0, 4  ;;  %s116_s9 = smov [#allocation2]   ;;  %s14_s8 = int_to_ptr.hbm [resolvable:$true] %s13_s8 }
   0x2   :  { %s15_s10 = sshll.u32 %s116_s9, 4  ;;  %s16_s10 = int_to_ptr.vmem [resolvable:$true] %s15_s10 }
   0x3   :  { %18 = dma.hbm_to_vmem [thread:$0]  %s14_s8, 256, %s16_s10, [#allocation3]  }
   0x4   :  { %112 = dma.done.wait [#allocation3], 256  }
   0x5   :  { %113 = vsyncadd [#allocation3], 4294967040  ;;  %v23_v0 = vld [vmem:[#allocation2] sm:$0xff]  ;;  %v24_v1 = vld [vmem:[#allocation2 + $0x8] sm:$0xff]  ;;  %s117_s0 = smov [#allocation5]   ;;  %s36_s14 = sshll.u32 %s135_s1, 4  ;;  %s37_s14 = int_to_ptr.hbm [resolvable:$true] %s36_s14 }
   0x6   :  { %v48_v2 = vcvt.f32.s32 %v23_v0  ;;  %v46_v3 = vand.u32 2147483647, %v23_v0  ;;  %v56_v4 = vcvt.f32.s32 %v24_v1  ;;  %v51_v6 = vand.u32 2147483648, %v23_v0  ;;  %s34_s11 = sshll.u32 %s117_s0, 4  ;;  %s35_s11 = int_to_ptr.vmem [resolvable:$true] %s34_s11 }
   0x7   :  { %v54_v7 = vand.u32 2147483647, %v24_v1  ;;  %v59_v9 = vand.u32 2147483648, %v24_v1 }
   0x8   :  { %v49_v5 = vcvt.s32.f32 %v48_v2  ;;  %v57_v8 = vcvt.s32.f32 %v56_v4  ;;  %vm47_vm0 = vcmp.lt.f32.partialorder %v46_v3, 8388608.0 }
   0x9   :  { %vm55_vm1 = vcmp.lt.f32.partialorder %v54_v7, 8388608.0 }
   0xa   :  { %v50_v10 = vand.u32 2147483647, %v49_v5  ;;  %v58_v11 = vand.u32 2147483647, %v57_v8 }
   0xc   :  { %v52_v12 = vor.u32 %v51_v6, %v50_v10  ;;  %v60_v13 = vor.u32 %v59_v9, %v58_v11 }
   0xe   :  { %v53_v14 = vsel %vm47_vm0, %v52_v12, %v23_v0  ;;  %v61_v15 = vsel %vm55_vm1, %v60_v13, %v24_v1 }
   0xf   :  { %27 = vst [vmem:[#allocation5] sm:$0xff] %v53_v14 }
  0x10   :  { %28 = vst [vmem:[#allocation5 + $0x8] sm:$0xff] %v61_v15 }
  0x11   :  { %39 = dma.vmem_to_hbm [thread:$0]  %s35_s11, 256, %s37_s14, [#allocation4]  }
  0x12   :  { %114 = dma.done.wait [#allocation4], 256  }
  0x13   :  { %115 = vsyncadd [#allocation4], 4294967040 }
  0x14   :  { %44 = vsyncpa [#allocation3], 1 }
  0x15   :  { %45 = vsyncpa [#allocation4], 1 }

</bundles_post_ra>
